<compile_context>
chip_gen: v5e
topology: v5e:2x2
jax: 0.10.0
libtpu: 0.0.40
codegen_flags: <defaults>
</compile_context>

<pallas_src>
from functools import partial

import jax
import jax.numpy as jnp
from jax import lax
from jax.experimental import pallas as pl
from jax.experimental.pallas import tpu as pltpu


def _round_up(v: int, m: int) -> int:
    return (v + m - 1) // m * m


def _conv2d_kernel(xa_ref, xb_ref, w_ref, b_ref, o_ref, xt_ref, *,
                   kh, kw, stride, halo):
    """One output-row tile.

    xa_ref : (R, W_al)         VMEM  input rows of this tile (R = T*stride)
    xb_ref : (8, W_al)         VMEM  first rows of the next tile (bottom halo)
    w_ref  : (kh, kw)          SMEM  kernel weights (scalars)
    b_ref  : (1,)              SMEM  bias scalar
    o_ref  : (T, W_out_al)     VMEM  output tile, lane-dense (mult. of 128)
    xt_ref : (R + halo, W_al)  VMEM  scratch: tile + halo, contiguous rows
    """
    t_rows, w_out = o_ref.shape
    r_rows = xa_ref.shape[0]
    rd = stride * (t_rows - 1) + 1          # dense row span read per tap
    wd = stride * (w_out - 1) + 1           # dense col span read per tap

    # Stage tile + halo contiguously so every tap is a plain row-offset ref
    # read.  This is VMEM-to-VMEM only (the kernel is HBM-bound, VMEM traffic
    # is not the binding unit) and keeps halo handling branch-free.
    xt_ref[0:r_rows, :] = xa_ref[...]
    if halo > 0:
        xt_ref[r_rows:r_rows + halo, :] = xb_ref[0:halo, :]

    # Hoist all kh*kw scalar weight reads (SMEM) out of the accumulation loop.
    w = [[w_ref[a, b] for b in range(kw)] for a in range(kh)]

    acc = jnp.zeros((rd, wd), jnp.float32)
    for a in range(kh):                      # static, fully unrolled (kh*kw small)
        # Row (sublane) shift comes straight from the ref; in-kernel f32 cast.
        rows_a = xt_ref[pl.ds(a, rd), :].astype(jnp.float32)
        for b in range(kw):
            # Column (lane) shift: small static-offset window of rows_a.
            patch = lax.slice(rows_a, (0, b), (rd, b + wd))
            acc = acc + w[a][b] * patch

    if stride > 1:
        # Single decimation at the end instead of per-tap strided slices.
        acc = lax.slice(acc, (0, 0), (rd, wd), (stride, stride))

    o_ref[...] = (acc + b_ref[0]).astype(o_ref.dtype)


@partial(jax.jit, static_argnames=("stride", "padding"))
def conv2d_forward(x, weight, bias, *, stride=1, padding=1):
    """Pallas equivalent of Conv2D.forward (2-D input, 2-D kernel, scalar bias)."""
    assert x.ndim == 2 and weight.ndim == 2
    h_in, w_in = x.shape
    kh, kw = weight.shape
    stride = int(stride)

    # The PyTorch module pads by exactly 1 on each side for ANY nonzero padding.
    pad_amt = 1 if padding != 0 else 0
    h_p, w_p = h_in + 2 * pad_amt, w_in + 2 * pad_amt
    h_out = (h_p - kh) // stride + 1
    w_out = (w_p - kw) // stride + 1

    # ---- tiling -------------------------------------------------------------
    # Lane-dense output width (multiple of 128); extra columns sliced off below.
    w_out_al = _round_up(w_out, 128)
    # Input width must cover the dense tap span of the padded output columns.
    w_al = _round_up(max(w_p, stride * (w_out_al - 1) + kw), 128)

    # Output rows per tile: multiple of 8, sized to keep each (double-buffered)
    # input block around ~2 MiB so it fits every generation's default scoped
    # VMEM with pipelining headroom.
    itemsize = x.dtype.itemsize
    rows_budget = max(8, ((2 << 20) // max(1, w_al * itemsize * stride)) // 8 * 8)
    t_rows = int(min(rows_budget, 512, _round_up(h_out, 8)))
    n_tiles = (h_out + t_rows - 1) // t_rows
    r_rows = t_rows * stride                 # input rows per tile (multiple of 8)
    halo = max(kh - stride, 0)               # extra bottom rows needed per tile
    if halo > 8:
        raise NotImplementedError("kernel height too large for the 8-row halo block")

    # Total padded rows: n_tiles main blocks + one 8-row halo block.
    h_al = _round_up(max(n_tiles * r_rows + 8, h_p), 8)

    # One pad fuses: conv zero-padding + row/lane alignment + halo rows.
    # (Input keeps its original dtype in HBM; the f32 cast happens in-kernel.)
    x_al = jnp.pad(
        x, ((pad_amt, h_al - h_in - pad_amt), (pad_amt, w_al - w_in - pad_amt)))

    kernel = partial(_conv2d_kernel, kh=kh, kw=kw, stride=stride, halo=halo)
    blocks_per_tile = r_rows // 8

    out_full = pl.pallas_call(
        kernel,
        out_shape=jax.ShapeDtypeStruct((n_tiles * t_rows, w_out_al), jnp.float32),
        grid=(n_tiles,),
        in_specs=[
            # main input rows of tile i
            pl.BlockSpec((r_rows, w_al), lambda i: (i, 0)),
            # bottom halo: first 8 rows of tile i+1 (same array, second view)
            pl.BlockSpec((8, w_al), lambda i: ((i + 1) * blocks_per_tile, 0)),
            pl.BlockSpec(memory_space=pltpu.MemorySpace.SMEM),   # weights (scalars)
            pl.BlockSpec(memory_space=pltpu.MemorySpace.SMEM),   # bias scalar
        ],
        out_specs=pl.BlockSpec((t_rows, w_out_al), lambda i: (i, 0)),
        scratch_shapes=[pltpu.VMEM((r_rows + halo, w_al), x.dtype)],
        compiler_params=pltpu.CompilerParams(
            dimension_semantics=("parallel",)),
    )(x_al, x_al, weight.astype(jnp.float32), bias.astype(jnp.float32))

    # Drop alignment padding -> exact PyTorch output shape.
    return out_full[:h_out, :w_out]


if __name__ == "__main__":
    key = jax.random.PRNGKey(0)
    k_x, k_w, k_b = jax.random.split(key, 3)

    # Small shapes consistent with the module: 2-D input, 2x2 learned kernel,
    # stride=1, padding=1 (the module defaults).
    H, W = 16, 16
    KH, KW = 2, 2
    stride, padding = 1, 1

    x = jax.random.normal(k_x, (H, W), dtype=jnp.float32)
    weight = jax.random.normal(k_w, (KH, KW), dtype=jnp.float32)  # nn.Parameter(randn(shape))
    bias = jax.random.normal(k_b, (1,), dtype=jnp.float32)        # nn.Parameter(randn(1))

    out = conv2d_forward(x, weight, bias, stride=stride, padding=padding)
    out = jax.block_until_ready(out)

    # Pure-JAX reference (lax.conv_general_dilated is cross-correlation, no flip).
    x_pad = jnp.pad(x, ((1, 1), (1, 1)))
    ref = lax.conv_general_dilated(
        x_pad[None, None], weight[None, None],
        window_strides=(stride, stride), padding="VALID",
    )[0, 0] + bias[0]

    assert out.shape == ((H + 2 - KH) // stride + 1, (W + 2 - KW) // stride + 1)
    assert jnp.allclose(out, ref, atol=1e-5, rtol=1e-5), "mismatch vs reference"

    print("KERNEL_OK")
</pallas_src>

<mosaic_0001>
module attributes {stable_mosaic.version = 11 : i64} {
  func.func @_conv2d_kernel(%arg0: i32, %arg1: memref<24x256xf32, #tpu.memory_space<vmem>>, %arg2: memref<8x256xf32, #tpu.memory_space<vmem>>, %arg3: memref<2x2xf32, #tpu.memory_space<smem>>, %arg4: memref<1xf32, #tpu.memory_space<smem>>, %arg5: memref<24x128xf32, #tpu.memory_space<vmem>>, %arg6: memref<25x256xf32, #tpu.memory_space<vmem>>) attributes {dimension_semantics = [#tpu.dimension_semantics<parallel>], iteration_bounds = array<i64: 1>, scalar_prefetch = 0 : i64, scratch_operands = 1 : i64, tpu.core_type = #tpu.core_type<tc>, window_params = [{transform_indices = @transform_0, window_bounds = array<i64: 24, 256>}, {transform_indices = @transform_1, window_bounds = array<i64: 8, 256>}, {transform_indices = @transform_2, window_bounds = array<i64: 2, 2>}, {transform_indices = @transform_3, window_bounds = array<i64: 1>}, {transform_indices = @transform_4, window_bounds = array<i64: 24, 128>}]} {
    %c0 = arith.constant 0 : index
    %c0_0 = arith.constant 0 : index
    %0 = vector.load %arg1[%c0, %c0_0] : memref<24x256xf32, #tpu.memory_space<vmem>>, vector<24x256xf32>
    %c0_1 = arith.constant 0 : index
    %c0_2 = arith.constant 0 : index
    %1 = vector.load %arg6[%c0_1, %c0_2] : memref<25x256xf32, #tpu.memory_space<vmem>>, vector<24x256xf32>
    tpu.vector_store %arg6[%c0_1, %c0_2], %0 {strides = array<i32>} : memref<25x256xf32, #tpu.memory_space<vmem>>, vector<24x256xf32>,
    %c0_3 = arith.constant 0 : index
    %c0_4 = arith.constant 0 : index
    %2 = vector.load %arg2[%c0_3, %c0_4] : memref<8x256xf32, #tpu.memory_space<vmem>>, vector<1x256xf32>
    %c24 = arith.constant 24 : index
    %c0_5 = arith.constant 0 : index
    %3 = vector.load %arg6[%c24, %c0_5] : memref<25x256xf32, #tpu.memory_space<vmem>>, vector<1x256xf32>
    tpu.vector_store %arg6[%c24, %c0_5], %2 {strides = array<i32>} : memref<25x256xf32, #tpu.memory_space<vmem>>, vector<1x256xf32>,
    %c0_6 = arith.constant 0 : index
    %c0_7 = arith.constant 0 : index
    %4 = memref.load %arg3[%c0_6, %c0_7] : memref<2x2xf32, #tpu.memory_space<smem>>
    %c0_8 = arith.constant 0 : index
    %c1 = arith.constant 1 : index
    %5 = memref.load %arg3[%c0_8, %c1] : memref<2x2xf32, #tpu.memory_space<smem>>
    %c1_9 = arith.constant 1 : index
    %c0_10 = arith.constant 0 : index
    %6 = memref.load %arg3[%c1_9, %c0_10] : memref<2x2xf32, #tpu.memory_space<smem>>
    %c1_11 = arith.constant 1 : index
    %c1_12 = arith.constant 1 : index
    %7 = memref.load %arg3[%c1_11, %c1_12] : memref<2x2xf32, #tpu.memory_space<smem>>
    %cst = arith.constant 0.000000e+00 : f32
    %8 = vector.broadcast %cst : f32 to vector<24x128xf32>
    %c0_13 = arith.constant 0 : index
    %c0_14 = arith.constant 0 : index
    %9 = vector.load %arg6[%c0_13, %c0_14] : memref<25x256xf32, #tpu.memory_space<vmem>>, vector<24x256xf32>
    %10 = vector.extract_strided_slice %9 {offsets = [0, 0], sizes = [24, 128], strides = [1, 1]} : vector<24x256xf32> to vector<24x128xf32>
    %11 = vector.broadcast %4 : f32 to vector<24x128xf32>
    %12 = arith.mulf %11, %10 : vector<24x128xf32>
    %13 = arith.addf %8, %12 : vector<24x128xf32>
    %14 = vector.extract_strided_slice %9 {offsets = [0, 1], sizes = [24, 128], strides = [1, 1]} : vector<24x256xf32> to vector<24x128xf32>
    %15 = vector.broadcast %5 : f32 to vector<24x128xf32>
    %16 = arith.mulf %15, %14 : vector<24x128xf32>
    %17 = arith.addf %13, %16 : vector<24x128xf32>
    %c1_15 = arith.constant 1 : index
    %c0_16 = arith.constant 0 : index
    %18 = vector.load %arg6[%c1_15, %c0_16] : memref<25x256xf32, #tpu.memory_space<vmem>>, vector<24x256xf32>
    %19 = vector.extract_strided_slice %18 {offsets = [0, 0], sizes = [24, 128], strides = [1, 1]} : vector<24x256xf32> to vector<24x128xf32>
    %20 = vector.broadcast %6 : f32 to vector<24x128xf32>
    %21 = arith.mulf %20, %19 : vector<24x128xf32>
    %22 = arith.addf %17, %21 : vector<24x128xf32>
    %23 = vector.extract_strided_slice %18 {offsets = [0, 1], sizes = [24, 128], strides = [1, 1]} : vector<24x256xf32> to vector<24x128xf32>
    %24 = vector.broadcast %7 : f32 to vector<24x128xf32>
    %25 = arith.mulf %24, %23 : vector<24x128xf32>
    %26 = arith.addf %22, %25 : vector<24x128xf32>
    %c0_17 = arith.constant 0 : index
    %27 = memref.load %arg4[%c0_17] : memref<1xf32, #tpu.memory_space<smem>>
    %28 = vector.broadcast %27 : f32 to vector<24x128xf32>
    %29 = arith.addf %26, %28 : vector<24x128xf32>
    %c0_18 = arith.constant 0 : index
    %c0_19 = arith.constant 0 : index
    %30 = vector.load %arg5[%c0_18, %c0_19] : memref<24x128xf32, #tpu.memory_space<vmem>>, vector<24x128xf32>
    tpu.vector_store %arg5[%c0_18, %c0_19], %29 {strides = array<i32>} : memref<24x128xf32, #tpu.memory_space<vmem>>, vector<24x128xf32>,
    return
  }
  func.func @transform_0(%arg0: i32) -> (i32, i32) {
    %c0_i32 = arith.constant 0 : i32
    %c0_i32_0 = arith.constant 0 : i32
    return %arg0, %c0_i32 : i32, i32
  }
  func.func @transform_1(%arg0: i32) -> (i32, i32) {
    %c1_i32 = arith.constant 1 : i32
    %0 = arith.addi %arg0, %c1_i32 : i32
    %c3_i32 = arith.constant 3 : i32
    %1 = arith.muli %0, %c3_i32 : i32
    %c0_i32 = arith.constant 0 : i32
    %c0_i32_0 = arith.constant 0 : i32
    return %1, %c0_i32 : i32, i32
  }
  func.func @transform_2(%arg0: i32) -> (i32, i32) {
    %c0_i32 = arith.constant 0 : i32
    %c0_i32_0 = arith.constant 0 : i32
    %c0_i32_1 = arith.constant 0 : i32
    return %c0_i32, %c0_i32_0 : i32, i32
  }
  func.func @transform_3(%arg0: i32) -> i32 {
    %c0_i32 = arith.constant 0 : i32
    %c0_i32_0 = arith.constant 0 : i32
    return %c0_i32 : i32
  }
  func.func @transform_4(%arg0: i32) -> (i32, i32) {
    %c0_i32 = arith.constant 0 : i32
    %c0_i32_0 = arith.constant 0 : i32
    return %arg0, %c0_i32 : i32, i32
  }
}

</mosaic_0001>

<bundles_post_ra>
// kernel: conv2d_forward.1
= control target key start
LH: loop header
LB: loop body
LE: loop exit
PB: predicated region body
PF: predicated region fallthrough
CT: control target
= control target key end

     0   :  { %10 = vsyncpa [#allocation6], 0  ;;  %s394_s0 = inlined_call_operand.vmem [shape: f32[32,256], index: 0, kind: input, shape index: {}, may-alias: {0,1}]   ;;  %s395_s1 = inlined_call_operand.vmem [shape: f32[32,256], index: 1, kind: input, shape index: {}, may-alias: {0,1}]   ;;  %s396_s2 = inlined_call_operand.vmem [shape: f32[2,2], index: 2, kind: input, shape index: {}]   ;;  %s397_s3 = inlined_call_operand.<no memory space> [shape: f32[1], index: 3, kind: input, shape index: {}]   ;;  %s398_s4 = inlined_call_operand.hbm [shape: f32[24,128], index: 4, kind: output, shape index: {}]  }
   0x1   :  { %11 = vsyncpa [#allocation5], 0  ;;  %s30_s17 = sshll.u32 %s396_s2, 4  ;;  %s290_s18 = smov [#allocation4]   ;;  %s31_s17 = int_to_ptr.vmem [resolvable:$true] %s30_s17 }
   0x2   :  { %33 = dma.vmem_to_smem %s31_s17, 32, %s290_s18, [#allocation6]  }
   0x3   :  { %286 = dma.done.wait [#allocation6], 32  }
   0x4   :  { %287 = vsyncadd [#allocation6], 4294967264 }
   0x5   :  { %40 = sfence }
   0x6   :  { %v326_v0 = vld [vmem:[%s394_s0 + $0x10] sm:$0xff]  ;;  %s242_s21 = sld [smem:[#allocation4 + $0x1]]  ;;  %v70_v1 = vlaneseq  ;;  %v331_v2 = vld [vmem:[%s394_s0] sm:$0xff]  ;;  %v58_v3 = vld [vmem:[%s394_s0 + $0x8] sm:$0xff]  ;;  %s291_s8 = smov 127   ;;  %vm142_vm1 = vcmask 1046528  }
   0x7   :  { %63 = vst [vmem:[#allocation2] sm:$0xff] %v331_v2  ;;  %v60_v4 = vld [vmem:[%s394_s0 + $0x18] sm:$0xff]  ;;  %s244_s27 = sld [smem:[#allocation4 + $0x81]]  ;;  %v343_v5 = vld [vmem:[%s394_s0 + $0x20] sm:$0xff]  ;;  %v62_v7 = vld [vmem:[%s394_s0 + $0x28] sm:$0xff]  ;;  %vm119_vm2 = vcmask 1039360  }
   0x8   :  { %64 = vst [vmem:[#allocation2 + $0x8] sm:$0xff] %v58_v3  ;;  %v241_v6 = vld [vmem:[%s395_s1 + $0x30] ss:$8 sm:$0x3]  ;;  %vm72_vm0 = vcmp.lt.s32.totalorder %v70_v1, 256  ;;  %s243_s0 = sld [smem:[#allocation4 + $0x80]] }
   0x9   :  { %75 = vst.msk [vmem:[#allocation2 + $0x30] ss:$8 sm:$0x3] %vm72_vm0, %v241_v6  ;;  %s77_s1 = sld [smem:[#allocation4]]  ;;  %s222_s14 = sshll.u32 %s398_s4, 4  ;;  %s223_s14 = int_to_ptr.hbm [resolvable:$true] %s222_s14 }
   0xa   :  { %s293_s15 = smov 128   ;;  %s294_s16 = smov 8  }
   0xc   :  { %v94_v8 = vstv %s242_s21 }
   0xd   :  { %v97_v9 = vmul.f32 %v94_v8, %v326_v0  ;;  %v95_v10 = vmul.f32 %v94_v8, %v331_v2  ;;  %v99_v11 = vmul.f32 %v94_v8, %v343_v5  ;;  %v156_v12 = vstv %s244_s27 }
   0xe   :  { %v129_v14 = vld [vmem:[#allocation2] sm:$0xfe]  ;;  %v98_v15 = vmul.f32 %v94_v8, %v60_v4  ;;  %v96_v16 = vmul.f32 %v94_v8, %v58_v3  ;;  %v100_v17 = vmul.f32 %v94_v8, %v62_v7  ;;  %v160_v18 = vmul.f32 %v156_v12, %v60_v4 }
   0xf   :  { %111 = vrot.lane.b32.xlu1 %v97_v9, %s291_s8  ;;  %107 = vrot.lane.b32.xlu0 %v95_v10, %s291_s8  ;;  %v130_v13 = vld [vmem:[#allocation2 + $0x8] sm:$0xfe]  ;;  %v157_v20 = vmul.f32 %v156_v12, %v129_v14  ;;  %v159_v21 = vmul.f32 %v156_v12, %v326_v0  ;;  %v161_v22 = vmul.f32 %v156_v12, %v343_v5  ;;  %v133_v43 = vstv %s243_s0 }
  0x10   :  { %115 = vrot.lane.b32.xlu2 %v99_v11, %s291_s8  ;;  %v158_v19 = vmul.f32 %v156_v12, %v130_v13  ;;  %v177_v24 = vrot.slane %v160_v18, 1  ;;  %v131_v27 = vld [vmem:[#allocation2 + $0x30] sm:$0x1]  ;;  %v132_v28 = vld [vmem:[#allocation2 + $0x38] sm:$0x1]  ;;  %v162_v32 = vmul.f32 %v156_v12, %v62_v7  ;;  %v135_v46 = vmul.f32 %v133_v43, %v326_v0 }
  0x11   :  { %v173_v25 = vrot.slane %v157_v20, 1  ;;  %v174_v26 = vrot.slane %v159_v21, 1  ;;  %v179_v29 = vrot.slane %v161_v22, 1  ;;  %v163_v33 = vmul.f32 %v156_v12, %v131_v27 }
  0x12   :  { %v176_v23 = vrot.slane %v158_v19, 1  ;;  %v164_v35 = vmul.f32 %v156_v12, %v132_v28  ;;  %v181_v37 = vrot.slane %v162_v32, 1  ;;  %v134_v47 = vmul.f32 %v133_v43, %v129_v14 }
  0x13   :  { %v175_v31 = vsel %vm142_vm1, %v173_v25, %v174_v26  ;;  %v180_v34 = vsel %vm142_vm1, %v174_v26, %v179_v29  ;;  %v183_v36 = vrot.slane %v163_v33, 1  ;;  %v144_v49 = vrot.slane %v135_v46, 1 }
  0x14   :  { %v178_v30 = vsel %vm142_vm1, %v176_v23, %v177_v24  ;;  %v185_v38 = vrot.slane %v164_v35, 1  ;;  %v182_v40 = vsel %vm142_vm1, %v177_v24, %v181_v37  ;;  %v87_v50 = vstv %s77_s1 }
  0x15   :  { %v184_v39 = vsel %vm142_vm1, %v179_v29, %v183_v36  ;;  %v143_v51 = vrot.slane %v134_v47, 1  ;;  %v88_v52 = vmul.f32 %v87_v50, %v331_v2  ;;  %v136_v58 = vmul.f32 %v133_v43, %v343_v5 }
  0x16   :  { %v186_v41 = vsel %vm142_vm1, %v181_v37, %v185_v38  ;;  %v137_v59 = vmul.f32 %v133_v43, %v131_v27  ;;  %v90_v1 = vmul.f32 %v87_v50, %v343_v5  ;;  %v89_v3 = vmul.f32 %v87_v50, %v326_v0 }
  0x17   :  { %113 = vrot.lane.b32.xlu1 %v98_v15, %s291_s8  ;;  %109 = vrot.lane.b32.xlu0 %v96_v16, %s291_s8  ;;  %v145_v56 = vsel %vm142_vm1, %v143_v51, %v144_v49  ;;  %v146_v62 = vrot.slane %v136_v58, 1  ;;  %v209_v8 = vstv %s397_s3  ;;  %s292_s3 = smov [#allocation7]  }
  0x18   :  { %117 = vrot.lane.b32.xlu2 %v100_v17, %s291_s8  ;;  %v148_v63 = vrot.slane %v137_v59, 1  ;;  %s220_s11 = sshll.u32 %s292_s3, 4  ;;  %s221_s11 = int_to_ptr.vmem [resolvable:$true] %s220_s11 }
  0x19   :  { %v147_v0 = vsel %vm142_vm1, %v144_v49, %v146_v62 }
  0x1a   :  { %v149_v5 = vsel %vm142_vm1, %v146_v62, %v148_v63 }
  0x1f   :  { %189 = vrot.lane.b32.xlu1 %v178_v30, %s291_s8  ;;  %187 = vrot.lane.b32.xlu0 %v175_v31, %s291_s8 }
  0x20   :  { %191 = vrot.lane.b32.xlu2 %v180_v34, %s291_s8 }
  0x27   :  { %195 = vrot.lane.b32.xlu1 %v184_v39, %s291_s8  ;;  %193 = vrot.lane.b32.xlu0 %v182_v40, %s291_s8 }
  0x28   :  { %197 = vrot.lane.b32.xlu2 %v186_v41, %s291_s8 }
  0x6a   :  { %v116_v42 = vpop.permute.xlu2 %115 }
  0x72   :  { %v118_v48 = vpop.permute.xlu2 %117 }
  0x73   :  { %v122_v6 = vsel %vm119_vm2, %v116_v42, %v118_v48 }
  0x74   :  { %v128_v11 = vadd.f32 %v122_v6, %v90_v1 }
  0x76   :  { %v155_v15 = vadd.f32 %v149_v5, %v128_v11 }
  0x7a   :  { %v192_v60 = vpop.permute.xlu2 %191 }
  0x81   :  { %v112_v44 = vpop.permute.xlu1 %111  ;;  %v108_v45 = vpop.permute.xlu0 %107 }
  0x82   :  { %v198_v14 = vpop.permute.xlu2 %197 }
  0x89   :  { %v114_v53 = vpop.permute.xlu1 %113  ;;  %v110_v54 = vpop.permute.xlu0 %109 }
  0x8a   :  { %v120_v55 = vsel %vm119_vm2, %v108_v45, %v110_v54  ;;  %v121_v7 = vsel %vm119_vm2, %v112_v44, %v114_v53 }
  0x8b   :  { %v126_v57 = vadd.f32 %v120_v55, %v88_v52  ;;  %v127_v12 = vadd.f32 %v121_v7, %v89_v3 }
  0x8d   :  { %v153_v61 = vadd.f32 %v145_v56, %v126_v57  ;;  %v154_v17 = vadd.f32 %v147_v0, %v127_v12 }
  0x91   :  { %v190_v2 = vpop.permute.xlu1 %189  ;;  %v188_v4 = vpop.permute.xlu0 %187 }
  0x92   :  { %v199_v9 = vsel %vm119_vm2, %v188_v4, %v190_v2 }
  0x93   :  { %v205_v10 = vadd.f32 %v199_v9, %v153_v61 }
  0x95   :  { %v210_v13 = vadd.f32 %v209_v8, %v205_v10 }
  0x97   :  { %213 = vst [vmem:[#allocation7] sm:$0xff] %v210_v13 }
  0x99   :  { %v196_v16 = vpop.permute.xlu1 %195  ;;  %v194_v18 = vpop.permute.xlu0 %193 }
  0x9a   :  { %v201_v19 = vsel %vm119_vm2, %v196_v16, %v198_v14  ;;  %v200_v20 = vsel %vm119_vm2, %v192_v60, %v194_v18 }
  0x9b   :  { %v207_v21 = vadd.f32 %v201_v19, %v155_v15  ;;  %v206_v22 = vadd.f32 %v200_v20, %v154_v17 }
  0x9d   :  { %v212_v23 = vadd.f32 %v209_v8, %v207_v21  ;;  %v211_v24 = vadd.f32 %v209_v8, %v206_v22 }
  0x9f   :  { %215 = vst [vmem:[#allocation7 + $0x10] sm:$0xff] %v212_v23 }
  0xa0   :  { %214 = vst [vmem:[#allocation7 + $0x8] sm:$0xff] %v211_v24 }
  0xa1   :  { %228 = dma.vmem_to_hbm [thread:$0]  %s221_s11, 384, %s223_s14, [#allocation5], %s293_s15, %s293_s15, %s294_s16  }
  0xa2   :  { %288 = dma.done.wait [#allocation5], 384  }
  0xa3   :  { %289 = vsyncadd [#allocation5], 4294966912 }
  0xa4   :  { %233 = vsyncpa [#allocation5], 1 }
  0xa5   :  { %234 = vsyncpa [#allocation6], 1 }

</bundles_post_ra>
